<compile_context>
chip_gen: v7x
topology: tpu7x:2x2x1
jax: 0.10.0
libtpu: 0.0.40
codegen_flags: <defaults>
</compile_context>

<pallas_src>
import jax
import jax.numpy as jnp
from jax.experimental import pallas as pl
from jax.experimental.pallas import tpu as pltpu


def _round_up(x, m):
    return ((x + m - 1) // m) * m


def _mlp_kernel(x_ref, w1_ref, b1_ref, w2_ref, b2_ref, w3_ref, b3_ref, o_ref):
    # x: (obs_dim, tb) f32, lane dim = batch (lane-dense).  Cast to bf16 on the VPU
    # (fully hidden under the input DMA); matmuls accumulate in f32 on the MXU;
    # bias add / ReLU stay f32 on the VPU, broadcasting (out, 1) biases over lanes.
    x = x_ref[...].astype(jnp.bfloat16)

    h = jnp.dot(w1_ref[...], x, preferred_element_type=jnp.float32)            # (h1, tb)
    h = jnp.maximum(h + b1_ref[...], 0.0)

    h = jnp.dot(w2_ref[...], h.astype(jnp.bfloat16),
                preferred_element_type=jnp.float32)                            # (h2, tb)
    h = jnp.maximum(h + b2_ref[...], 0.0)

    out = jnp.dot(w3_ref[...], h.astype(jnp.bfloat16),
                  preferred_element_type=jnp.float32)                          # (act, tb)
    o_ref[...] = (out + b3_ref[...]).astype(o_ref.dtype)


def mlp_q_estimator2_forward(obs, params, *, batch_tile=8192):
    """Forward pass of MLPQEstimator2.

    obs:    [B, obs_dim] float32
    params: ((w1, b1), (w2, b2), (w3, b3)) with w_i: [in, out] f32, b_i: [1, out] f32
    returns: [B, act_dim] float32 (or [B] if act_dim == 1, matching torch.squeeze(-1))
    """
    (w1, b1), (w2, b2), (w3, b3) = params
    B, obs_dim = obs.shape
    h1 = w1.shape[1]
    h2 = w2.shape[1]
    act_dim = w3.shape[1]

    # --- batch tile selection: lane dim = batch => multiple of 128 ---------------
    b128 = _round_up(B, 128)
    tb = min(_round_up(batch_tile, 128), b128)
    # v7x has 2 TensorCores: when the batch spans >= 2 lane tiles, pick tb so the
    # "parallel" grid has >= 2 steps and both cores get work (no-op on v5e/v6e).
    if b128 // tb < 2 and b128 >= 2 * 128:
        tb = _round_up(pl.cdiv(b128, 2), 128)
    b_pad = _round_up(B, tb)
    grid = (b_pad // tb,)

    # --- layout plumbing (no dtype cast of obs: the kernel reads f32 directly) ---
    obs_t = obs.T                                   # (obs_dim, B) f32, batch on lanes
    if b_pad != B:                                  # pad only when not tile-aligned
        obs_t = jnp.pad(obs_t, ((0, 0), (0, b_pad - B)))
    w1t = w1.T.astype(jnp.bfloat16)                 # (h1, obs_dim) — tiny, resident
    w2t = w2.T.astype(jnp.bfloat16)                 # (h2, h1)
    w3t = w3.T.astype(jnp.bfloat16)                 # (act_dim, h2)
    b1t = jnp.reshape(b1, (-1, 1))                  # (h1, 1) f32
    b2t = jnp.reshape(b2, (-1, 1))
    b3t = jnp.reshape(b3, (-1, 1))

    def resident(shape):
        # Full-array block, constant index -> stays in VMEM, no per-step re-DMA.
        return pl.BlockSpec(shape, lambda i: (0, 0))

    # --- VMEM budget (double-buffered obs/out tiles + live f32 intermediates) ----
    f32b = 4
    vmem_est = (2 * obs_dim * tb * f32b
                + 2 * max(act_dim, 8) * tb * f32b
                + 4 * max(h1, h2, 8) * tb * f32b)
    vmem_limit = None
    if vmem_est > (14 << 20):   # past v5e's 16 MiB scoped default -> ask explicitly
        vmem_limit = min(_round_up(vmem_est * 5 // 4, 1 << 20), 60 << 20)

    flops = 2 * b_pad * (obs_dim * h1 + h1 * h2 + h2 * act_dim)
    bytes_accessed = (
        obs_t.size * 4                                     # f32 obs read straight from HBM
        + (w1t.size + w2t.size + w3t.size) * 2             # bf16 resident weights
        + (b1t.size + b2t.size + b3t.size) * 4             # f32 biases
        + b_pad * act_dim * 4                              # f32 output
    )

    out = pl.pallas_call(
        _mlp_kernel,
        out_shape=jax.ShapeDtypeStruct((act_dim, b_pad), jnp.float32),
        grid=grid,
        in_specs=[
            pl.BlockSpec((obs_dim, tb), lambda i: (0, i)),  # obs: streamed, lane-dense
            resident(w1t.shape), resident(b1t.shape),        # weights/biases: VMEM-resident
            resident(w2t.shape), resident(b2t.shape),
            resident(w3t.shape), resident(b3t.shape),
        ],
        out_specs=pl.BlockSpec((act_dim, tb), lambda i: (0, i)),  # lane-dense output
        compiler_params=pltpu.CompilerParams(
            dimension_semantics=("parallel",),   # shard batch tiles across v7x's 2 TCs
            vmem_limit_bytes=vmem_limit,
        ),
        cost_estimate=pl.CostEstimate(
            flops=flops, transcendentals=0, bytes_accessed=bytes_accessed
        ),
    )(obs_t, w1t, b1t, w2t, b2t, w3t, b3t)

    out = out[:, :B]
    # torch.squeeze(-1): only drops the last dim if it has size 1 (pure wrapper glue
    # on the small (act_dim, B) slab; the lane-dense store already happened in-kernel).
    if act_dim == 1:
        return out.reshape(B)
    return out.T


def init_params(key, obs_dim, hidden_sizes, act_dim):
    """Deterministic init mirroring nn.Linear's default U(-1/sqrt(fan_in), 1/sqrt(fan_in))."""
    sizes = [obs_dim] + list(hidden_sizes) + [act_dim]
    params = []
    for i in range(len(sizes) - 1):
        fan_in, fan_out = sizes[i], sizes[i + 1]
        key, kw, kb = jax.random.split(key, 3)
        bound = 1.0 / jnp.sqrt(jnp.float32(fan_in))
        w = jax.random.uniform(kw, (fan_in, fan_out), jnp.float32, -bound, bound)
        b = jax.random.uniform(kb, (1, fan_out), jnp.float32, -bound, bound)
        params.append((w, b))
    return tuple(params)


def _ref_forward(obs, params):
    """Pure-JAX reference mimicking the kernel's bf16-operand / f32-accumulate numerics."""
    (w1, b1), (w2, b2), (w3, b3) = params
    f32 = jnp.float32
    bf = jnp.bfloat16
    x = obs.astype(bf).astype(f32)
    h = jnp.maximum(x @ w1.astype(bf).astype(f32) + b1, 0.0)
    h = h.astype(bf).astype(f32)
    h = jnp.maximum(h @ w2.astype(bf).astype(f32) + b2, 0.0)
    h = h.astype(bf).astype(f32)
    out = h @ w3.astype(bf).astype(f32) + b3
    if w3.shape[1] == 1:
        out = jnp.squeeze(out, axis=-1)
    return out


if __name__ == "__main__":
    key = jax.random.PRNGKey(0)

    obs_dim = 16
    hidden_sizes = [32, 32]
    act_dim = 4  # activation = nn.ReLU

    params = init_params(key, obs_dim, hidden_sizes, act_dim)

    # Case 1: tiny batch (single grid step, heavy padding).
    key, k_obs = jax.random.split(key)
    obs_small = jax.random.normal(k_obs, (8, obs_dim), jnp.float32)
    q_small = jax.block_until_ready(mlp_q_estimator2_forward(obs_small, params))
    ref_small = _ref_forward(obs_small, params)
    assert q_small.shape == (8, act_dim)
    assert jnp.allclose(q_small, ref_small, atol=2e-2, rtol=2e-2)

    # Case 2: batch not divisible by the lane tile -> exercises padding + multi-step
    # parallel grid (grid length 3 at tile 128).
    key, k_obs2 = jax.random.split(key)
    obs_big = jax.random.normal(k_obs2, (300, obs_dim), jnp.float32)
    q_big = jax.block_until_ready(
        mlp_q_estimator2_forward(obs_big, params, batch_tile=128)
    )
    ref_big = _ref_forward(obs_big, params)
    assert q_big.shape == (300, act_dim)
    assert jnp.allclose(q_big, ref_big, atol=2e-2, rtol=2e-2)

    # Case 3: act_dim == 1 -> torch.squeeze(-1) drops the last dim.
    params1 = init_params(jax.random.PRNGKey(1), obs_dim, hidden_sizes, 1)
    q_one = jax.block_until_ready(mlp_q_estimator2_forward(obs_small, params1))
    ref_one = _ref_forward(obs_small, params1)
    assert q_one.shape == (8,)
    assert jnp.allclose(q_one, ref_one, atol=2e-2, rtol=2e-2)

    print("KERNEL_OK")
</pallas_src>

<mosaic_0001>
module attributes {stable_mosaic.version = 11 : i64} {
  func.func @_mlp_kernel(%arg0: i32, %arg1: memref<16x128xf32, #tpu.memory_space<vmem>>, %arg2: memref<32x16xbf16, #tpu.memory_space<vmem>>, %arg3: memref<32x1xf32, #tpu.memory_space<vmem>>, %arg4: memref<32x32xbf16, #tpu.memory_space<vmem>>, %arg5: memref<32x1xf32, #tpu.memory_space<vmem>>, %arg6: memref<4x32xbf16, #tpu.memory_space<vmem>>, %arg7: memref<4x1xf32, #tpu.memory_space<vmem>>, %arg8: memref<4x128xf32, #tpu.memory_space<vmem>>) attributes {dimension_semantics = [#tpu.dimension_semantics<parallel>], iteration_bounds = array<i64: 1>, scalar_prefetch = 0 : i64, scratch_operands = 0 : i64, tpu.core_type = #tpu.core_type<tc>, window_params = [{transform_indices = @transform_0, window_bounds = array<i64: 16, 128>}, {pipeline_mode = #tpu.pipeline_mode<synchronous>, transform_indices = @transform_1, window_bounds = array<i64: 32, 16>}, {pipeline_mode = #tpu.pipeline_mode<synchronous>, transform_indices = @transform_2, window_bounds = array<i64: 32, 1>}, {pipeline_mode = #tpu.pipeline_mode<synchronous>, transform_indices = @transform_3, window_bounds = array<i64: 32, 32>}, {pipeline_mode = #tpu.pipeline_mode<synchronous>, transform_indices = @transform_4, window_bounds = array<i64: 32, 1>}, {pipeline_mode = #tpu.pipeline_mode<synchronous>, transform_indices = @transform_5, window_bounds = array<i64: 4, 32>}, {pipeline_mode = #tpu.pipeline_mode<synchronous>, transform_indices = @transform_6, window_bounds = array<i64: 4, 1>}, {transform_indices = @transform_7, window_bounds = array<i64: 4, 128>}]} {
    %c0 = arith.constant 0 : index
    %c0_0 = arith.constant 0 : index
    %0 = vector.load %arg1[%c0, %c0_0] : memref<16x128xf32, #tpu.memory_space<vmem>>, vector<16x128xf32>
    %1 = arith.truncf %0 : vector<16x128xf32> to vector<16x128xbf16>
    %c0_1 = arith.constant 0 : index
    %c0_2 = arith.constant 0 : index
    %2 = vector.load %arg2[%c0_1, %c0_2] : memref<32x16xbf16, #tpu.memory_space<vmem>>, vector<32x16xbf16>
    %cst = arith.constant dense<0.000000e+00> : vector<32x128xf32>
    %3 = tpu.matmul %2, %1, %cst {dimension_numbers = #tpu.dot_dimension_numbers<[1], [0], [0], [1], [0, 0, 1, 1], [], []>} : vector<32x16xbf16>, vector<16x128xbf16>, vector<32x128xf32> -> vector<32x128xf32>
    %c0_3 = arith.constant 0 : index
    %c0_4 = arith.constant 0 : index
    %4 = vector.load %arg3[%c0_3, %c0_4] : memref<32x1xf32, #tpu.memory_space<vmem>>, vector<32x1xf32>
    %5 = vector.broadcast %4 : vector<32x1xf32> to vector<32x128xf32>
    %6 = arith.addf %3, %5 : vector<32x128xf32>
    %cst_5 = arith.constant 0.000000e+00 : f32
    %7 = vector.broadcast %cst_5 : f32 to vector<32x128xf32>
    %8 = arith.maximumf %6, %7 : vector<32x128xf32>
    %c0_6 = arith.constant 0 : index
    %c0_7 = arith.constant 0 : index
    %9 = vector.load %arg4[%c0_6, %c0_7] : memref<32x32xbf16, #tpu.memory_space<vmem>>, vector<32x32xbf16>
    %10 = arith.truncf %8 : vector<32x128xf32> to vector<32x128xbf16>
    %cst_8 = arith.constant dense<0.000000e+00> : vector<32x128xf32>
    %11 = tpu.matmul %9, %10, %cst_8 {dimension_numbers = #tpu.dot_dimension_numbers<[1], [0], [0], [1], [0, 0, 1, 1], [], []>} : vector<32x32xbf16>, vector<32x128xbf16>, vector<32x128xf32> -> vector<32x128xf32>
    %c0_9 = arith.constant 0 : index
    %c0_10 = arith.constant 0 : index
    %12 = vector.load %arg5[%c0_9, %c0_10] : memref<32x1xf32, #tpu.memory_space<vmem>>, vector<32x1xf32>
    %13 = vector.broadcast %12 : vector<32x1xf32> to vector<32x128xf32>
    %14 = arith.addf %11, %13 : vector<32x128xf32>
    %cst_11 = arith.constant 0.000000e+00 : f32
    %15 = vector.broadcast %cst_11 : f32 to vector<32x128xf32>
    %16 = arith.maximumf %14, %15 : vector<32x128xf32>
    %c0_12 = arith.constant 0 : index
    %c0_13 = arith.constant 0 : index
    %17 = vector.load %arg6[%c0_12, %c0_13] : memref<4x32xbf16, #tpu.memory_space<vmem>>, vector<4x32xbf16>
    %18 = arith.truncf %16 : vector<32x128xf32> to vector<32x128xbf16>
    %cst_14 = arith.constant dense<0.000000e+00> : vector<4x128xf32>
    %19 = tpu.matmul %17, %18, %cst_14 {dimension_numbers = #tpu.dot_dimension_numbers<[1], [0], [0], [1], [0, 0, 1, 1], [], []>} : vector<4x32xbf16>, vector<32x128xbf16>, vector<4x128xf32> -> vector<4x128xf32>
    %c0_15 = arith.constant 0 : index
    %c0_16 = arith.constant 0 : index
    %20 = vector.load %arg7[%c0_15, %c0_16] : memref<4x1xf32, #tpu.memory_space<vmem>>, vector<4x1xf32>
    %21 = vector.broadcast %20 : vector<4x1xf32> to vector<4x128xf32>
    %22 = arith.addf %19, %21 : vector<4x128xf32>
    %c0_17 = arith.constant 0 : index
    %c0_18 = arith.constant 0 : index
    %23 = vector.load %arg8[%c0_17, %c0_18] : memref<4x128xf32, #tpu.memory_space<vmem>>, vector<4x128xf32>
    tpu.vector_store %arg8[%c0_17, %c0_18], %22 {strides = array<i32>} : memref<4x128xf32, #tpu.memory_space<vmem>>, vector<4x128xf32>,
    return
  }
  func.func @transform_0(%arg0: i32) -> (i32, i32) {
    %c0_i32 = arith.constant 0 : i32
    %c0_i32_0 = arith.constant 0 : i32
    return %c0_i32, %arg0 : i32, i32
  }
  func.func @transform_1(%arg0: i32) -> (i32, i32) {
    %c0_i32 = arith.constant 0 : i32
    %c0_i32_0 = arith.constant 0 : i32
    %c0_i32_1 = arith.constant 0 : i32
    return %c0_i32, %c0_i32_0 : i32, i32
  }
  func.func @transform_2(%arg0: i32) -> (i32, i32) {
    %c0_i32 = arith.constant 0 : i32
    %c0_i32_0 = arith.constant 0 : i32
    %c0_i32_1 = arith.constant 0 : i32
    return %c0_i32, %c0_i32_0 : i32, i32
  }
  func.func @transform_3(%arg0: i32) -> (i32, i32) {
    %c0_i32 = arith.constant 0 : i32
    %c0_i32_0 = arith.constant 0 : i32
    %c0_i32_1 = arith.constant 0 : i32
    return %c0_i32, %c0_i32_0 : i32, i32
  }
  func.func @transform_4(%arg0: i32) -> (i32, i32) {
    %c0_i32 = arith.constant 0 : i32
    %c0_i32_0 = arith.constant 0 : i32
    %c0_i32_1 = arith.constant 0 : i32
    return %c0_i32, %c0_i32_0 : i32, i32
  }
  func.func @transform_5(%arg0: i32) -> (i32, i32) {
    %c0_i32 = arith.constant 0 : i32
    %c0_i32_0 = arith.constant 0 : i32
    %c0_i32_1 = arith.constant 0 : i32
    return %c0_i32, %c0_i32_0 : i32, i32
  }
  func.func @transform_6(%arg0: i32) -> (i32, i32) {
    %c0_i32 = arith.constant 0 : i32
    %c0_i32_0 = arith.constant 0 : i32
    %c0_i32_1 = arith.constant 0 : i32
    return %c0_i32, %c0_i32_0 : i32, i32
  }
  func.func @transform_7(%arg0: i32) -> (i32, i32) {
    %c0_i32 = arith.constant 0 : i32
    %c0_i32_0 = arith.constant 0 : i32
    return %c0_i32, %arg0 : i32, i32
  }
}

</mosaic_0001>

<bundles_post_ra>
// kernel: tpu_custom_call.1
= control target key start
LH: loop header
LB: loop body
LE: loop exit
PB: predicated region body
PF: predicated region fallthrough
CT: control target
= control target key end

     0   :  { %vm69_vm0 = vcmask 130048   ;;  %v371_v4 = vmov 0   ;;  %s480_s0 = inlined_call_operand.vmem [shape: f32[16,128], index: 0, kind: input, shape index: {}]   ;;  %s481_s1 = inlined_call_operand.vmem [shape: bf16[32,16], index: 1, kind: input, shape index: {}]   ;;  %s482_s2 = inlined_call_operand.vmem [shape: f32[32,1], index: 2, kind: input, shape index: {}]   ;;  %s483_s3 = inlined_call_operand.vmem [shape: bf16[32,32], index: 3, kind: input, shape index: {}]   ;;  %s484_s4 = inlined_call_operand.vmem [shape: f32[32,1], index: 4, kind: input, shape index: {}]   ;;  %s485_s5 = inlined_call_operand.vmem [shape: bf16[4,32], index: 5, kind: input, shape index: {}]   ;;  %s486_s6 = inlined_call_operand.vmem [shape: f32[4,1], index: 6, kind: input, shape index: {}]   ;;  %s487_s7 = inlined_call_operand.hbm [shape: f32[4,128], index: 7, kind: output, shape index: {}]  }
   0x1   :  { %v28_v0 = vld [vmem:[%s480_s0] sm:$0xff]  ;;  %v29_v1 = vld [vmem:[%s480_s0 + $0x8] sm:$0xff]  ;;  %341 = vset.pattern.permute.xlu0 %v371_v4  ;;  %342 = vset.pattern.permute.xlu1 %v371_v4  ;;  %v37_v7 = vld [vmem:[%s482_s2 + $0x10] sm:$0xff] }
   0x2   :  { %v30_v2 = vpack.c.bf16 %v29_v1, %v28_v0  ;;  %v343_v3 = vld [vmem:[%s481_s1] sm:$0xff]   ;;  %v344_v6 = vld [vmem:[%s481_s1 + $0x8] sm:$0xff]   ;;  %51 = vperm.xlu1 %342, %v37_v7   ;;  %v38_v9 = vld [vmem:[%s482_s2 + $0x18] sm:$0xff] }
   0x3   :  { %v35_v5 = vld [vmem:[%s482_s2] sm:$0xff]  ;;  %317 = vmatprep.mubr.msk.bf16.mxu0 %vm69_vm0, %v343_v3  ;;  %v36_v8 = vld [vmem:[%s482_s2 + $0x8] sm:$0xff] }
   0x4   :  { %315 = vmatprep.subr.bf16.mxu0 %v30_v2  ;;  %41 = vperm.xlu0 %341, %v35_v5  }
   0x5   :  { %316 = vmatpush3.bf16.msra.mxu0 %v30_v2 }
   0x8   :  { %318 = vmatmul.mubr.msk.bf16.vlgmr.msra.gmra.mrb[0].mxu0 %vm69_vm0, %v344_v6 }
   0x9   :  { %12 = vsyncpa [#allocation3], 0  ;;  %46 = vperm.xlu0 %341, %v36_v8   ;;  %v135_v10 = vld [vmem:[%s484_s4] sm:$0xff]  ;;  %56 = vperm.xlu1 %342, %v38_v9   ;;  %v136_v11 = vld [vmem:[%s484_s4 + $0x8] sm:$0xff]  ;;  %vm169_vm1 = vcmask 261120   ;;  %v372_v35 = vmov 0.0  }
   0xa   :  { %v137_v12 = vld [vmem:[%s484_s4 + $0x10] sm:$0xff]  ;;  %v138_v13 = vld [vmem:[%s484_s4 + $0x18] sm:$0xff]  ;;  %v232_v14 = vld [vmem:[%s486_s6] sm:$0xf]  ;;  %329 = vmatprep.subr.bf16.mxu0 %v372_v35  ;;  %vm373_vm2 = vmmov 0   ;;  %s374_s27 = smov [#allocation2]  }
   0xb   :  { %v345_v15 = vld [vmem:[%s483_s3] sm:$0xff]   ;;  %v346_v34 = vld [vmem:[%s483_s3 + $0x8] sm:$0xff]   ;;  %333 = vmatprep.mubr.msk.bf16.mxu0 %vm373_vm2, %v372_v35  ;;  %s288_s28 = sshll.u32 %s374_s27, 4  ;;  %s289_s28 = int_to_ptr.vmem [resolvable:$true] %s288_s28 }
   0xc   :  { %325 = vmatprep.mubr.msk.bf16.mxu1 %vm169_vm1, %v345_v15  ;;  %v229_v54 = vld [vmem:[%s485_s5] sm:$0x3]  ;;  %s347_s29 = scalar_lea.vmem %s289_s28, 64  ;;  %p352_p1 = scmp.lt.s32.totalorder %s289_s28, %s289_s28 }
   0xd   :  { %141 = vperm.xlu0 %341, %v135_v10   ;;  %146 = vperm.xlu1 %342, %v136_v11   ;;  %p348_p0 = scmp.ne.s32.totalorder %s289_s28, %s347_s29  ;;  %p353_p2 = scmp.lt.s32.totalorder %s347_s29, %s347_s29 }
   0xf   :  { %p354_p3 = por %p353_p2, %p352_p1 }
  0x11   :  { %151 = vperm.xlu0 %341, %v137_v12   ;;  %156 = vperm.xlu1 %342, %v138_v13   ;;  %p355_p4 = pnand %p354_p3, %p348_p0 }
  0x15   :  { %235 = vperm.xlu0 %341, %v232_v14  }
  0x81   :  { %v52_v16 = vpop.permute.xlu1 %51 }
  0x83   :  { %v42_v17 = vpop.permute.xlu0 %41 }
  0x88   :  { %v57_v21 = vpop.permute.xlu1 %56  ;;  %v47_v24 = vpop.permute.xlu0 %46 }
  0x8c   :  { %v142_v36 = vpop.permute.xlu0 %141  ;;  %v147_v37 = vpop.permute.xlu1 %146 }
  0x90   :  { %v152_v38 = vpop.permute.xlu0 %151  ;;  %v157_v42 = vpop.permute.xlu1 %156 }
  0x94   :  { %v236_v55 = vpop.permute.xlu0 %235 }
  0xdb   :  { %v319_v18 = vpop.f32.mrb[0].mxu0 }
  0xdc   :  { %v119_v19 = vadd.f32 %v319_v18, %v52_v16  ;;  %v110_v20 = vpop.f32.mrb[1].mxu0 }
  0xdd   :  { %v111_v22 = vadd.f32 %v110_v20, %v42_v17  ;;  %v320_v23 = vpop.f32.mrb[2].mxu0 }
  0xde   :  { %v122_v25 = vadd.f32 %v320_v23, %v57_v21  ;;  %v113_v26 = vpop.f32.mrb[3].mxu0  ;;  %v127_v28 = vmax.f32 %v119_v19, 0.0 }
  0xdf   :  { %v114_v27 = vadd.f32 %v113_v26, %v47_v24  ;;  %v125_v30 = vmax.f32 %v111_v22, 0.0 }
  0xe0   :  { %v128_v29 = vmax.f32 %v122_v25, 0.0 }
  0xe1   :  { %v126_v31 = vmax.f32 %v114_v27, 0.0 }
  0xe2   :  { %v134_v32 = vpack.c.bf16 %v128_v29, %v127_v28 }
  0xe3   :  { %v133_v33 = vpack.c.bf16 %v126_v31, %v125_v30 }
  0xe5   :  { %321 = vmatprep.subr.bf16.mxu1 %v133_v33 }
  0xe6   :  { %322 = vmatpush3.bf16.msra.mxu1 %v133_v33 }
  0xe7   :  { %323 = vmatprep.subr.bf16.mxu1 %v134_v32 }
  0xea   :  { %324 = vmatpush3.bf16.msra.mxu1 %v134_v32 }
  0xed   :  { %326 = vmatmul.mubr.msk.bf16.vlgmr.msra.gmra.mrb[0].mxu1 %vm169_vm1, %v346_v34 }
 0x1c0   :  { %v327_v39 = vpop.f32.mrb[0].mxu1 }
 0x1c1   :  { %v219_v40 = vadd.f32 %v327_v39, %v152_v38  ;;  %v210_v41 = vpop.f32.mrb[1].mxu1 }
 0x1c2   :  { %v211_v43 = vadd.f32 %v210_v41, %v142_v36  ;;  %v328_v44 = vpop.f32.mrb[2].mxu1 }
 0x1c3   :  { %v222_v45 = vadd.f32 %v328_v44, %v157_v42  ;;  %v213_v46 = vpop.f32.mrb[3].mxu1  ;;  %v227_v48 = vmax.f32 %v219_v40, 0.0 }
 0x1c4   :  { %v214_v47 = vadd.f32 %v213_v46, %v147_v37  ;;  %v225_v50 = vmax.f32 %v211_v43, 0.0 }
 0x1c5   :  { %v228_v49 = vmax.f32 %v222_v45, 0.0 }
 0x1c6   :  { %v226_v51 = vmax.f32 %v214_v47, 0.0 }
 0x1c7   :  { %v231_v52 = vpack.c.bf16 %v228_v49, %v227_v48 }
 0x1c8   :  { %v230_v53 = vpack.c.bf16 %v226_v51, %v225_v50 }
 0x1ca   :  { %330 = vmatpush3.bf16.msra.mxu0 %v230_v53 }
 0x1cb   :  { %331 = vmatprep.subr.bf16.mxu0 %v372_v35 }
 0x1ce   :  { %332 = vmatpush3.bf16.msra.mxu0 %v231_v52 }
 0x1d1   :  { %334 = vmatmul.mubr.msk.bf16.vlgmr.msra.gmra.mrb[4].mxu0 %vm169_vm1, %v229_v54 }
 0x2a4   :  { %v275_v56 = vpop.f32.mrb[4].mxu0 }
 0x2a5   :  { %v276_v57 = vadd.f32 %v275_v56, %v236_v55  ;;  %v335_v58 = vpop.f32.mrb[5].mxu0 }
 0x2a6   :  { %v278_v59 = vpop.f32.mrb[6].mxu0 }
 0x2a7   :  { %281 = vst [vmem:[#allocation2] sm:$0xf] %v276_v57  ;;  %v336_v60 = vpop.f32.mrb[7].mxu0 }
 0x2a8   :  { %358 = shalt.err (!%p355_p4)
}
 0x2a9   :  { %s359_s8 = scalar_lea.hbm %s487_s7, 64 }
 0x2aa   :  { %p360_p5 = scmp.ne.s32.totalorder %s487_s7, %s359_s8  ;;  %p363_p6 = scmp.lt.u32.totalorder %s359_s8, %s487_s7 }
 0x2ac   :  { %p365_p7 = pnand %p363_p6, %p360_p5 }
 0x2ae   :  { %368 = shalt.err (!%p365_p7)
}
 0x2af   :  { %291 = dma.vmem_to_hbm [thread:$0]  %s289_s28, 64, %s487_s7, [#allocation3]  }
 0x2b0   :  { %369 = dma.done.wait [#allocation3], 64  }
 0x2b1   :  { %370 = vsyncadd [#allocation3], 4294967232 }
 0x2b2   :  { %295 = vsyncpa [#allocation3], 1 }

</bundles_post_ra>
